<compile_context>
chip_gen: v7x
topology: tpu7x:2x2x1
jax: 0.10.0
libtpu: 0.0.40
codegen_flags: <defaults>
</compile_context>

<pallas_src>
import functools

import jax
import jax.numpy as jnp
from jax.experimental import pallas as pl
from jax.experimental.pallas import tpu as pltpu


def _round_up(x: int, m: int) -> int:
    return (x + m - 1) // m * m


def _shared_binary_classifier_kernel(x_ref, w1_ref, b1_ref, w2_ref, b2_ref, o_ref):
    # x: (TB, D_in_p) bf16, w1: (D_in_p, H_p) bf16, b1: (1, H_p) f32,
    # w2: (H_p, NOD_p) bf16, b2: (1, NOD_p) f32, o: (TB, NOD_p) f32
    x = x_ref[...]
    h = jnp.dot(x, w1_ref[...], preferred_element_type=jnp.float32)
    h = jnp.maximum(h + b1_ref[...], 0.0)          # Linear_in bias + ReLU (f32)
    # Dropout: identity (eval mode)
    h = h.astype(w2_ref.dtype)                     # bf16 operands for second MXU pass
    o = jnp.dot(h, w2_ref[...], preferred_element_type=jnp.float32)
    o_ref[...] = (o + b2_ref[...]).astype(o_ref.dtype)


@functools.partial(jax.jit, static_argnames=("num_fxns", "output_dim", "block_b"))
def shared_binary_classifier_forward(x, w1, b1, w2_stacked, b2_stacked,
                                     num_fxns, output_dim, block_b=512):
    """x: (B, input_dim) float32.
    w1: (input_dim, hidden), b1: (hidden,)
    w2_stacked: (hidden, num_fxns*output_dim), b2_stacked: (num_fxns*output_dim,)
    Returns: (B, num_fxns, output_dim) float32.
    """
    compute_dtype = jnp.bfloat16

    B, d_in = x.shape
    hidden = w1.shape[1]
    nf_od = num_fxns * output_dim

    # --- wrapper-side padding to MXU/lane-friendly shapes -------------------
    d_in_p = _round_up(d_in, 128)          # K of first matmul -> full lane tiles
    h_p = _round_up(hidden, 128)           # N of 1st / K of 2nd matmul
    nod_p = _round_up(nf_od, 128)          # lane-dense output (unmasked vst)

    tb = min(block_b, _round_up(B, 8))     # batch tile (sublane multiple of 8)
    bp = _round_up(B, tb)
    grid = (bp // tb,)

    xp = jnp.zeros((bp, d_in_p), compute_dtype).at[:B, :d_in].set(
        x.astype(compute_dtype))
    w1p = jnp.zeros((d_in_p, h_p), compute_dtype).at[:d_in, :hidden].set(
        w1.astype(compute_dtype))
    b1p = jnp.zeros((1, h_p), jnp.float32).at[0, :hidden].set(
        b1.astype(jnp.float32))
    w2p = jnp.zeros((h_p, nod_p), compute_dtype).at[:hidden, :nf_od].set(
        w2_stacked.astype(compute_dtype))
    b2p = jnp.zeros((1, nod_p), jnp.float32).at[0, :nf_od].set(
        b2_stacked.astype(jnp.float32))

    # --- VMEM budget / cost hints -------------------------------------------
    itm = jnp.dtype(compute_dtype).itemsize
    vmem_bytes = (2 * tb * d_in_p * itm           # double-buffered x tiles
                  + 2 * tb * nod_p * 4            # double-buffered out tiles
                  + (d_in_p * h_p + h_p * nod_p) * itm   # resident weights
                  + (h_p + nod_p) * 4             # resident biases
                  + tb * h_p * 4)                 # f32 hidden activations
    vmem_limit = min(max(int(vmem_bytes * 1.5) + (1 << 20), 4 << 20), 100 << 20)

    cost = pl.CostEstimate(
        flops=2 * bp * (d_in_p * h_p + h_p * nod_p),
        transcendentals=0,
        bytes_accessed=(xp.size * itm + w1p.size * itm + w2p.size * itm
                        + b1p.size * 4 + b2p.size * 4 + bp * nod_p * 4),
    )

    out_flat = pl.pallas_call(
        _shared_binary_classifier_kernel,
        out_shape=jax.ShapeDtypeStruct((bp, nod_p), jnp.float32),
        grid_spec=pltpu.PrefetchScalarGridSpec(
            num_scalar_prefetch=0,
            grid=grid,
            in_specs=[
                pl.BlockSpec((tb, d_in_p), lambda i: (i, 0)),      # x: tiled
                pl.BlockSpec((d_in_p, h_p), lambda i: (0, 0)),     # W1: resident
                pl.BlockSpec((1, h_p), lambda i: (0, 0)),          # b1: resident
                pl.BlockSpec((h_p, nod_p), lambda i: (0, 0)),      # W2: resident
                pl.BlockSpec((1, nod_p), lambda i: (0, 0)),        # b2: resident
            ],
            out_specs=pl.BlockSpec((tb, nod_p), lambda i: (i, 0)), # lane-dense out
        ),
        compiler_params=pltpu.CompilerParams(
            dimension_semantics=("parallel",),   # megacore-shard batch tiles (v7x)
            vmem_limit_bytes=vmem_limit,
        ),
        cost_estimate=cost,
    )(xp, w1p, b1p, w2p, b2p)

    # Glue: strip batch/lane padding, then reshape to (B, num_fxns, output_dim)
    # matching torch.cat(dim=1) over the per-function classifier outputs.
    return out_flat[:B, :nf_od].reshape(B, num_fxns, output_dim)


def _reference_forward_bf16(x, w1, b1, w2_stacked, b2_stacked, num_fxns, output_dim):
    """Reference matching the kernel's bf16-operand / f32-accumulate numerics."""
    xb = x.astype(jnp.bfloat16)
    w1b = w1.astype(jnp.bfloat16)
    w2b = w2_stacked.astype(jnp.bfloat16)
    h = jnp.dot(xb, w1b, preferred_element_type=jnp.float32) + b1
    h = jnp.maximum(h, 0.0)
    out = jnp.dot(h.astype(jnp.bfloat16), w2b,
                  preferred_element_type=jnp.float32) + b2_stacked
    return out.reshape(x.shape[0], num_fxns, output_dim)


def _reference_forward_f32(x, w1, b1, w2_stacked, b2_stacked, num_fxns, output_dim):
    h = jnp.maximum(x @ w1 + b1, 0.0)
    out = h @ w2_stacked + b2_stacked
    return out.reshape(x.shape[0], num_fxns, output_dim)


if __name__ == "__main__":
    # Small, module-consistent shapes.
    batch = 8
    input_dim = 32
    hidden_dim = 64      # "param_budget"
    num_fxns = 4
    output_dim = 2

    key = jax.random.PRNGKey(0)
    kx, kw1, kb1, kw2, kb2 = jax.random.split(key, 5)

    x = jax.random.normal(kx, (batch, input_dim), dtype=jnp.float32)

    # Deterministic parameter init (synthetic, not a checkpoint load).
    w1 = jax.random.normal(kw1, (input_dim, hidden_dim), dtype=jnp.float32) * 0.1
    b1 = jax.random.normal(kb1, (hidden_dim,), dtype=jnp.float32) * 0.1
    # Per-function classifier weights stacked along the output axis:
    # equivalent to num_fxns independent Linear(hidden_dim, output_dim) layers.
    w2 = jax.random.normal(kw2, (hidden_dim, num_fxns * output_dim),
                           dtype=jnp.float32) * 0.1
    b2 = jax.random.normal(kb2, (num_fxns * output_dim,), dtype=jnp.float32) * 0.1

    out = shared_binary_classifier_forward(x, w1, b1, w2, b2,
                                           num_fxns, output_dim)
    out = jax.block_until_ready(out)
    assert out.shape == (batch, num_fxns, output_dim), out.shape

    # Tight check against a bf16-consistent reference (same compute numerics).
    ref_bf16 = _reference_forward_bf16(x, w1, b1, w2, b2, num_fxns, output_dim)
    assert jnp.allclose(out, ref_bf16, atol=1e-4, rtol=1e-4), \
        "mismatch vs bf16-consistent reference"

    # Loose check against the pure-f32 PyTorch-equivalent reference.
    ref_f32 = _reference_forward_f32(x, w1, b1, w2, b2, num_fxns, output_dim)
    assert jnp.allclose(out, ref_f32, atol=5e-2, rtol=5e-2), \
        "mismatch vs f32 reference"

    print("KERNEL_OK")
</pallas_src>

<mosaic_0001>
module attributes {stable_mosaic.version = 11 : i64} {
  func.func @_shared_binary_classifier_kernel(%arg0: i32, %arg1: memref<8x128xbf16, #tpu.memory_space<vmem>>, %arg2: memref<128x128xbf16, #tpu.memory_space<vmem>>, %arg3: memref<1x128xf32, #tpu.memory_space<vmem>>, %arg4: memref<128x128xbf16, #tpu.memory_space<vmem>>, %arg5: memref<1x128xf32, #tpu.memory_space<vmem>>, %arg6: memref<8x128xf32, #tpu.memory_space<vmem>>) attributes {dimension_semantics = [#tpu.dimension_semantics<parallel>], iteration_bounds = array<i64: 1>, scalar_prefetch = 0 : i64, scratch_operands = 0 : i64, tpu.core_type = #tpu.core_type<tc>, window_params = [{transform_indices = @transform_0, window_bounds = array<i64: 8, 128>}, {pipeline_mode = #tpu.pipeline_mode<synchronous>, transform_indices = @transform_1, window_bounds = array<i64: 128, 128>}, {pipeline_mode = #tpu.pipeline_mode<synchronous>, transform_indices = @transform_2, window_bounds = array<i64: 1, 128>}, {pipeline_mode = #tpu.pipeline_mode<synchronous>, transform_indices = @transform_3, window_bounds = array<i64: 128, 128>}, {pipeline_mode = #tpu.pipeline_mode<synchronous>, transform_indices = @transform_4, window_bounds = array<i64: 1, 128>}, {transform_indices = @transform_5, window_bounds = array<i64: 8, 128>}]} {
    %c0 = arith.constant 0 : index
    %c0_0 = arith.constant 0 : index
    %0 = vector.load %arg1[%c0, %c0_0] : memref<8x128xbf16, #tpu.memory_space<vmem>>, vector<8x128xbf16>
    %c0_1 = arith.constant 0 : index
    %c0_2 = arith.constant 0 : index
    %1 = vector.load %arg2[%c0_1, %c0_2] : memref<128x128xbf16, #tpu.memory_space<vmem>>, vector<128x128xbf16>
    %cst = arith.constant dense<0.000000e+00> : vector<8x128xf32>
    %2 = tpu.matmul %0, %1, %cst {dimension_numbers = #tpu.dot_dimension_numbers<[1], [0], [0], [1], [0, 0, 1, 1], [], []>} : vector<8x128xbf16>, vector<128x128xbf16>, vector<8x128xf32> -> vector<8x128xf32>
    %c0_3 = arith.constant 0 : index
    %c0_4 = arith.constant 0 : index
    %3 = vector.load %arg3[%c0_3, %c0_4] : memref<1x128xf32, #tpu.memory_space<vmem>>, vector<1x128xf32>
    %4 = vector.broadcast %3 : vector<1x128xf32> to vector<8x128xf32>
    %5 = arith.addf %2, %4 : vector<8x128xf32>
    %cst_5 = arith.constant 0.000000e+00 : f32
    %6 = vector.broadcast %cst_5 : f32 to vector<8x128xf32>
    %7 = arith.maximumf %5, %6 : vector<8x128xf32>
    %8 = arith.truncf %7 : vector<8x128xf32> to vector<8x128xbf16>
    %c0_6 = arith.constant 0 : index
    %c0_7 = arith.constant 0 : index
    %9 = vector.load %arg4[%c0_6, %c0_7] : memref<128x128xbf16, #tpu.memory_space<vmem>>, vector<128x128xbf16>
    %cst_8 = arith.constant dense<0.000000e+00> : vector<8x128xf32>
    %10 = tpu.matmul %8, %9, %cst_8 {dimension_numbers = #tpu.dot_dimension_numbers<[1], [0], [0], [1], [0, 0, 1, 1], [], []>} : vector<8x128xbf16>, vector<128x128xbf16>, vector<8x128xf32> -> vector<8x128xf32>
    %c0_9 = arith.constant 0 : index
    %c0_10 = arith.constant 0 : index
    %11 = vector.load %arg5[%c0_9, %c0_10] : memref<1x128xf32, #tpu.memory_space<vmem>>, vector<1x128xf32>
    %12 = vector.broadcast %11 : vector<1x128xf32> to vector<8x128xf32>
    %13 = arith.addf %10, %12 : vector<8x128xf32>
    %c0_11 = arith.constant 0 : index
    %c0_12 = arith.constant 0 : index
    %14 = vector.load %arg6[%c0_11, %c0_12] : memref<8x128xf32, #tpu.memory_space<vmem>>, vector<8x128xf32>
    tpu.vector_store %arg6[%c0_11, %c0_12], %13 {strides = array<i32>} : memref<8x128xf32, #tpu.memory_space<vmem>>, vector<8x128xf32>,
    return
  }
  func.func @transform_0(%arg0: i32) -> (i32, i32) {
    %c0_i32 = arith.constant 0 : i32
    %c0_i32_0 = arith.constant 0 : i32
    return %arg0, %c0_i32 : i32, i32
  }
  func.func @transform_1(%arg0: i32) -> (i32, i32) {
    %c0_i32 = arith.constant 0 : i32
    %c0_i32_0 = arith.constant 0 : i32
    %c0_i32_1 = arith.constant 0 : i32
    return %c0_i32, %c0_i32_0 : i32, i32
  }
  func.func @transform_2(%arg0: i32) -> (i32, i32) {
    %c0_i32 = arith.constant 0 : i32
    %c0_i32_0 = arith.constant 0 : i32
    %c0_i32_1 = arith.constant 0 : i32
    return %c0_i32, %c0_i32_0 : i32, i32
  }
  func.func @transform_3(%arg0: i32) -> (i32, i32) {
    %c0_i32 = arith.constant 0 : i32
    %c0_i32_0 = arith.constant 0 : i32
    %c0_i32_1 = arith.constant 0 : i32
    return %c0_i32, %c0_i32_0 : i32, i32
  }
  func.func @transform_4(%arg0: i32) -> (i32, i32) {
    %c0_i32 = arith.constant 0 : i32
    %c0_i32_0 = arith.constant 0 : i32
    %c0_i32_1 = arith.constant 0 : i32
    return %c0_i32, %c0_i32_0 : i32, i32
  }
  func.func @transform_5(%arg0: i32) -> (i32, i32) {
    %c0_i32 = arith.constant 0 : i32
    %c0_i32_0 = arith.constant 0 : i32
    return %arg0, %c0_i32 : i32, i32
  }
}

</mosaic_0001>

<bundles_post_ra>
// kernel: shared_binary_classifier_forward.1
= control target key start
LH: loop header
LB: loop body
LE: loop exit
PB: predicated region body
PF: predicated region fallthrough
CT: control target
= control target key end

     0   :  { %v345_v0 = vmov 0.0   ;;  %vm346_vm0 = vmmov 0   ;;  %s437_s1 = inlined_call_operand.vmem [shape: bf16[128,128], index: 1, kind: input, shape index: {}]   ;;  %s438_s3 = inlined_call_operand.vmem [shape: bf16[128,128], index: 3, kind: input, shape index: {}]   ;;  %s439_s0 = inlined_call_operand.vmem [shape: bf16[8,128], index: 0, kind: input, shape index: {}]   ;;  %s440_s2 = inlined_call_operand.vmem [shape: f32[1,128], index: 2, kind: input, shape index: {}]   ;;  %s441_s4 = inlined_call_operand.vmem [shape: f32[1,128], index: 4, kind: input, shape index: {}]   ;;  %s442_s5 = inlined_call_operand.vmem [shape: f32[8,128], index: 5, kind: output, shape index: {}]  }
   0x1   :  { %287 = vmatprep.subr.bf16.mxu0 %v345_v0  ;;  %v329_v1 = vld [vmem:[%s437_s1] sm:$0xff]   ;;  %303 = vmatprep.mubr.msk.bf16.mxu0 %vm346_vm0, %v345_v0  ;;  %v330_v2 = vld [vmem:[%s437_s1 + $0x8] sm:$0xff]   ;;  %v331_v3 = vld [vmem:[%s437_s1 + $0x10] sm:$0xff]  }
   0x2   :  { %307 = vmatprep.subr.bf16.mxu1 %v345_v0  ;;  %323 = vmatprep.mubr.msk.bf16.mxu1 %vm346_vm0, %v345_v0  ;;  %v337_v4 = vld [vmem:[%s438_s3] sm:$0xff]   ;;  %v332_v5 = vld [vmem:[%s437_s1 + $0x18] sm:$0xff]   ;;  %v338_v6 = vld [vmem:[%s438_s3 + $0x8] sm:$0xff]  }
   0x3   :  { %288 = vmatpush3.bf16.msra.mxu0 %v329_v1  ;;  %308 = vmatpush3.bf16.msra.mxu1 %v337_v4  ;;  %v333_v7 = vld [vmem:[%s437_s1 + $0x20] sm:$0xff]   ;;  %v339_v8 = vld [vmem:[%s438_s3 + $0x10] sm:$0xff]   ;;  %v334_v9 = vld [vmem:[%s437_s1 + $0x28] sm:$0xff]  }
   0x4   :  { %289 = vmatprep.subr.bf16.mxu0 %v345_v0  ;;  %309 = vmatprep.subr.bf16.mxu1 %v345_v0  ;;  %v340_v10 = vld [vmem:[%s438_s3 + $0x18] sm:$0xff]   ;;  %v335_v11 = vld [vmem:[%s437_s1 + $0x30] sm:$0xff]   ;;  %v341_v12 = vld [vmem:[%s438_s3 + $0x20] sm:$0xff]  }
   0x5   :  { %v336_v13 = vld [vmem:[%s437_s1 + $0x38] sm:$0xff]   ;;  %v342_v14 = vld [vmem:[%s438_s3 + $0x28] sm:$0xff]   ;;  %v21_v15 = vld [vmem:[%s439_s0] sm:$0xf] }
   0x6   :  { %v343_v16 = vld [vmem:[%s438_s3 + $0x30] sm:$0xff]   ;;  %v344_v17 = vld [vmem:[%s438_s3 + $0x38] sm:$0xff]   ;;  %v251_v18 = vld [vmem:[%s440_s2] ss:$0 sm:$0xff] }
   0x7   :  { %290 = vmatpush3.bf16.msra.mxu0 %v330_v2  ;;  %310 = vmatpush3.bf16.msra.mxu1 %v338_v6  ;;  %v260_v26 = vld [vmem:[%s441_s4] ss:$0 sm:$0xff] }
   0x8   :  { %291 = vmatprep.subr.bf16.mxu0 %v345_v0  ;;  %311 = vmatprep.subr.bf16.mxu1 %v345_v0 }
   0xb   :  { %292 = vmatpush3.bf16.msra.mxu0 %v331_v3  ;;  %312 = vmatpush3.bf16.msra.mxu1 %v339_v8 }
   0xc   :  { %293 = vmatprep.subr.bf16.mxu0 %v345_v0  ;;  %313 = vmatprep.subr.bf16.mxu1 %v345_v0 }
   0xf   :  { %294 = vmatpush3.bf16.msra.mxu0 %v332_v5  ;;  %314 = vmatpush3.bf16.msra.mxu1 %v340_v10 }
  0x10   :  { %295 = vmatprep.subr.bf16.mxu0 %v345_v0  ;;  %315 = vmatprep.subr.bf16.mxu1 %v345_v0 }
  0x13   :  { %296 = vmatpush3.bf16.msra.mxu0 %v333_v7  ;;  %316 = vmatpush3.bf16.msra.mxu1 %v341_v12 }
  0x14   :  { %297 = vmatprep.subr.bf16.mxu0 %v345_v0  ;;  %317 = vmatprep.subr.bf16.mxu1 %v345_v0 }
  0x17   :  { %298 = vmatpush3.bf16.msra.mxu0 %v334_v9  ;;  %318 = vmatpush3.bf16.msra.mxu1 %v342_v14 }
  0x18   :  { %299 = vmatprep.subr.bf16.mxu0 %v345_v0  ;;  %319 = vmatprep.subr.bf16.mxu1 %v345_v0 }
  0x1b   :  { %300 = vmatpush3.bf16.msra.mxu0 %v335_v11  ;;  %320 = vmatpush3.bf16.msra.mxu1 %v343_v16 }
  0x1c   :  { %301 = vmatprep.subr.bf16.mxu0 %v345_v0  ;;  %321 = vmatprep.subr.bf16.mxu1 %v345_v0 }
  0x1f   :  { %302 = vmatpush3.bf16.msra.mxu0 %v336_v13  ;;  %322 = vmatpush3.bf16.msra.mxu1 %v344_v17 }
  0x22   :  { %304 = vmatmul.mubr.bf16.vlgmr.msra.gmra.mrb[0].mxu0 %v21_v15 }
  0xf5   :  { %v127_v19 = vpop.f32.mrb[0].mxu0 }
  0xf6   :  { %v128_v20 = vadd.f32 %v251_v18, %v127_v19  ;;  %v305_v21 = vpop.f32.mrb[1].mxu0 }
  0xf7   :  { %v130_v22 = vpop.f32.mrb[2].mxu0 }
  0xf8   :  { %v133_v23 = vmax.f32 %v128_v20, 0.0  ;;  %v306_v24 = vpop.f32.mrb[3].mxu0 }
  0xfa   :  { %v134_v25 = vpack.c.bf16 %v133_v23, %v133_v23 }
  0xfc   :  { %324 = vmatmul.mubr.bf16.vlgmr.msra.gmra.mrb[0].mxu1 %v134_v25 }
 0x1cf   :  { %v240_v27 = vpop.f32.mrb[0].mxu1 }
 0x1d0   :  { %v241_v28 = vadd.f32 %v260_v26, %v240_v27  ;;  %v325_v29 = vpop.f32.mrb[1].mxu1 }
 0x1d1   :  { %v243_v30 = vpop.f32.mrb[2].mxu1 }
 0x1d2   :  { %246 = vst [vmem:[%s442_s5] sm:$0xff] %v241_v28  ;;  %v326_v31 = vpop.f32.mrb[3].mxu1 }

</bundles_post_ra>
